<compile_context>
chip_gen: v6e
topology: v6e:2x2x1
jax: 0.10.0
libtpu: 0.0.40
codegen_flags: <defaults>
</compile_context>

<pallas_src>
import jax
import jax.numpy as jnp
from jax.experimental import pallas as pl
from jax.experimental.pallas import tpu as pltpu


_LANE = 512           # lane-dense slab width (multiple of 128)
_MAX_TILE_ROWS = 512  # rows per grid step (multiple of 8); (512,512) f32 tile = 1 MiB
_NEG_PAD = -1e4       # padded logit -> softplus(x)=0, softplus(-x)*t=0 with t=0  => zero loss


def _round_up(x, m):
    return ((x + m - 1) // m) * m


def _bce_kernel(x_ref, t_ref, o_ref, acc_ref):
    """Accumulate clamped BCE-with-logits loss across the reduction grid axis."""
    s = pl.program_id(1)

    @pl.when(s == 0)
    def _init():
        acc_ref[...] = jnp.zeros_like(acc_ref)

    x = x_ref[...].astype(jnp.float32)
    t = t_ref[...].astype(jnp.float32)

    # sigmoid + BCE in logits space:
    #   log(sigmoid(x))     = -softplus(-x)
    #   log(1 - sigmoid(x)) = -softplus(x)
    # PyTorch BCELoss clamps each log at -100  ->  min(softplus, 100).
    sp_neg = jnp.maximum(-x, 0.0) + jnp.log1p(jnp.exp(-jnp.abs(x)))  # softplus(-x), stable
    sp_pos = sp_neg + x                                              # softplus(x), free VPU add
    per_elem = t * jnp.minimum(sp_neg, 100.0) + (1.0 - t) * jnp.minimum(sp_pos, 100.0)

    acc_ref[...] += per_elem

    @pl.when(s == pl.num_programs(1) - 1)
    def _finalize():
        tot = jnp.sum(acc_ref[...])
        o_ref[...] = jnp.zeros(o_ref.shape, jnp.float32) + tot   # splat per-core partial sum


def bce_loss(logits, target):
    """logits: (N, 1, H, W) float; target: (N, H, W) float/int/bool -> scalar f32 loss."""
    n, c, h, w = logits.shape
    assert c == 1, "BCELoss module squeezes channel dim 1 (expects C == 1)"
    total = n * h * w

    x = logits.reshape(-1)                       # keep native dtype in HBM (no upcast)
    t = target.reshape(-1)
    if not jnp.issubdtype(t.dtype, jnp.floating):
        t = t.astype(jnp.float32)                # torch does target.float()

    rows = -(-total // _LANE)                                   # cdiv
    tile_rows = min(_MAX_TILE_ROWS, _round_up(rows, 8))
    rows_pad = _round_up(rows, 2 * tile_rows)                   # even #tiles -> 2-way split
    pad = rows_pad * _LANE - total

    x = jnp.pad(x, (0, pad), constant_values=_NEG_PAD).reshape(rows_pad, _LANE)
    t = jnp.pad(t, (0, pad), constant_values=0).reshape(rows_pad, _LANE)

    n_tiles = rows_pad // tile_rows
    half = n_tiles // 2                                         # row-tiles per core-slice
    idx = lambda ci, si: (ci * half + si, 0)

    partials = pl.pallas_call(
        _bce_kernel,
        out_shape=jax.ShapeDtypeStruct((2, 8, 128), jnp.float32),
        grid_spec=pltpu.PrefetchScalarGridSpec(
            num_scalar_prefetch=0,
            grid=(2, half),
            in_specs=[
                pl.BlockSpec((tile_rows, _LANE), idx),
                pl.BlockSpec((tile_rows, _LANE), idx),
            ],
            out_specs=pl.BlockSpec((1, 8, 128), lambda ci, si: (ci, 0, 0)),
            scratch_shapes=[pltpu.VMEM((tile_rows, _LANE), jnp.float32)],
        ),
        compiler_params=pltpu.CompilerParams(
            dimension_semantics=("parallel", "arbitrary")),
    )(x, t)

    # Sum the two per-core partials and divide by the TRUE element count (not padded).
    return jnp.sum(partials[:, 0, 0]) / jnp.float32(total)


if __name__ == "__main__":
    key = jax.random.PRNGKey(0)
    k_x, k_t = jax.random.split(key)

    N, C, H, W = 2, 1, 16, 16
    logits = jax.random.normal(k_x, (N, C, H, W), dtype=jnp.float32)
    target = (jax.random.uniform(k_t, (N, H, W)) > 0.5).astype(jnp.float32)

    loss = jax.jit(bce_loss)(logits, target)
    jax.block_until_ready(loss)

    # Reference in plain JAX (same math as torch sigmoid + nn.BCELoss with -100 log clamp).
    p = jax.nn.sigmoid(logits.reshape(N, H, W).astype(jnp.float32))
    ref = -jnp.mean(
        target * jnp.maximum(jnp.log(p), -100.0)
        + (1.0 - target) * jnp.maximum(jnp.log(1.0 - p), -100.0)
    )
    assert jnp.allclose(loss, ref, rtol=1e-5, atol=1e-6), (loss, ref)

    print("KERNEL_OK")
</pallas_src>

<mosaic_0001>
module attributes {stable_mosaic.version = 11 : i64} {
  func.func @_bce_kernel(%arg0: i32, %arg1: i32, %arg2: memref<8x512xf32, #tpu.memory_space<vmem>>, %arg3: memref<8x512xf32, #tpu.memory_space<vmem>>, %arg4: memref<1x8x128xf32, #tpu.memory_space<vmem>>, %arg5: memref<8x512xf32, #tpu.memory_space<vmem>>) attributes {dimension_semantics = [#tpu.dimension_semantics<parallel>, #tpu.dimension_semantics<arbitrary>], iteration_bounds = array<i64: 2, 1>, scalar_prefetch = 0 : i64, scratch_operands = 1 : i64, tpu.core_type = #tpu.core_type<tc>, window_params = [{transform_indices = @transform_0, window_bounds = array<i64: 8, 512>}, {transform_indices = @transform_1, window_bounds = array<i64: 8, 512>}, {transform_indices = @transform_2, window_bounds = array<i64: 1, 8, 128>}]} {
    %c0_i32 = arith.constant 0 : i32
    %0 = arith.cmpi eq, %arg1, %c0_i32 : i32
    %1 = arith.extui %0 : i1 to i32
    %c0_i32_0 = arith.constant 0 : i32
    %2 = arith.cmpi ne, %1, %c0_i32_0 : i32
    scf.if %2 {
      %cst_15 = arith.constant 0.000000e+00 : f32
      %31 = vector.broadcast %cst_15 : f32 to vector<8x512xf32>
      %c0_16 = arith.constant 0 : index
      %c0_17 = arith.constant 0 : index
      %32 = vector.load %arg5[%c0_16, %c0_17] : memref<8x512xf32, #tpu.memory_space<vmem>>, vector<8x512xf32>
      tpu.vector_store %arg5[%c0_16, %c0_17], %31 {strides = array<i32>} : memref<8x512xf32, #tpu.memory_space<vmem>>, vector<8x512xf32>,
    } else {
    }
    %c0 = arith.constant 0 : index
    %c0_1 = arith.constant 0 : index
    %3 = vector.load %arg2[%c0, %c0_1] : memref<8x512xf32, #tpu.memory_space<vmem>>, vector<8x512xf32>
    %c0_2 = arith.constant 0 : index
    %c0_3 = arith.constant 0 : index
    %4 = vector.load %arg3[%c0_2, %c0_3] : memref<8x512xf32, #tpu.memory_space<vmem>>, vector<8x512xf32>
    %cst = arith.constant 0.000000e+00 : f32
    %5 = vector.broadcast %cst : f32 to vector<8x512xf32>
    %6 = arith.subf %5, %3 : vector<8x512xf32>
    %cst_4 = arith.constant 0.000000e+00 : f32
    %7 = vector.broadcast %cst_4 : f32 to vector<8x512xf32>
    %8 = arith.maximumf %6, %7 : vector<8x512xf32>
    %9 = math.absf %3 : vector<8x512xf32>
    %cst_5 = arith.constant 0.000000e+00 : f32
    %10 = vector.broadcast %cst_5 : f32 to vector<8x512xf32>
    %11 = arith.subf %10, %9 : vector<8x512xf32>
    %12 = math.exp %11 : vector<8x512xf32>
    %13 = math.log1p %12 : vector<8x512xf32>
    %14 = arith.addf %8, %13 : vector<8x512xf32>
    %15 = arith.addf %14, %3 : vector<8x512xf32>
    %cst_6 = arith.constant 1.000000e+02 : f32
    %16 = vector.broadcast %cst_6 : f32 to vector<8x512xf32>
    %17 = arith.minimumf %14, %16 : vector<8x512xf32>
    %18 = arith.mulf %4, %17 : vector<8x512xf32>
    %cst_7 = arith.constant 1.000000e+00 : f32
    %19 = vector.broadcast %cst_7 : f32 to vector<8x512xf32>
    %20 = arith.subf %19, %4 : vector<8x512xf32>
    %cst_8 = arith.constant 1.000000e+02 : f32
    %21 = vector.broadcast %cst_8 : f32 to vector<8x512xf32>
    %22 = arith.minimumf %15, %21 : vector<8x512xf32>
    %23 = arith.mulf %20, %22 : vector<8x512xf32>
    %24 = arith.addf %18, %23 : vector<8x512xf32>
    %c0_9 = arith.constant 0 : index
    %c0_10 = arith.constant 0 : index
    %25 = vector.load %arg5[%c0_9, %c0_10] : memref<8x512xf32, #tpu.memory_space<vmem>>, vector<8x512xf32>
    %26 = arith.addf %25, %24 : vector<8x512xf32>
    %c0_11 = arith.constant 0 : index
    %c0_12 = arith.constant 0 : index
    %27 = vector.load %arg5[%c0_11, %c0_12] : memref<8x512xf32, #tpu.memory_space<vmem>>, vector<8x512xf32>
    tpu.vector_store %arg5[%c0_11, %c0_12], %26 {strides = array<i32>} : memref<8x512xf32, #tpu.memory_space<vmem>>, vector<8x512xf32>,
    %c0_i32_13 = arith.constant 0 : i32
    %28 = arith.cmpi eq, %arg1, %c0_i32_13 : i32
    %29 = arith.extui %28 : i1 to i32
    %c0_i32_14 = arith.constant 0 : i32
    %30 = arith.cmpi ne, %29, %c0_i32_14 : i32
    scf.if %30 {
      %c0_15 = arith.constant 0 : index
      %c0_16 = arith.constant 0 : index
      %31 = vector.load %arg5[%c0_15, %c0_16] : memref<8x512xf32, #tpu.memory_space<vmem>>, vector<8x512xf32>
      %32 = vector.shape_cast %31 : vector<8x512xf32> to vector<1x8x512xf32>
      %cst_17 = arith.constant dense<0.000000e+00> : vector<1xf32>
      %33 = vector.multi_reduction <add>, %32, %cst_17 [1, 2] : vector<1x8x512xf32> to vector<1xf32>
      %34 = vector.shape_cast %33 : vector<1xf32> to vector<1x1x1xf32>
      %35 = vector.extract %34[0, 0, 0] : f32 from vector<1x1x1xf32>
      %cst_18 = arith.constant 0.000000e+00 : f32
      %36 = vector.broadcast %cst_18 : f32 to vector<1x8x128xf32>
      %37 = vector.broadcast %35 : f32 to vector<1x8x128xf32>
      %38 = arith.addf %36, %37 : vector<1x8x128xf32>
      %c0_19 = arith.constant 0 : index
      %c0_20 = arith.constant 0 : index
      %c0_21 = arith.constant 0 : index
      %39 = vector.load %arg4[%c0_19, %c0_20, %c0_21] : memref<1x8x128xf32, #tpu.memory_space<vmem>>, vector<1x8x128xf32>
      tpu.vector_store %arg4[%c0_19, %c0_20, %c0_21], %38 {strides = array<i32>} : memref<1x8x128xf32, #tpu.memory_space<vmem>>, vector<1x8x128xf32>,
    } else {
    }
    return
  }
  func.func @transform_0(%arg0: i32, %arg1: i32) -> (i32, i32) {
    %c1_i32 = arith.constant 1 : i32
    %0 = arith.muli %arg0, %c1_i32 : i32
    %1 = arith.addi %0, %arg1 : i32
    %c0_i32 = arith.constant 0 : i32
    %c0_i32_0 = arith.constant 0 : i32
    return %1, %c0_i32 : i32, i32
  }
  func.func @transform_1(%arg0: i32, %arg1: i32) -> (i32, i32) {
    %c1_i32 = arith.constant 1 : i32
    %0 = arith.muli %arg0, %c1_i32 : i32
    %1 = arith.addi %0, %arg1 : i32
    %c0_i32 = arith.constant 0 : i32
    %c0_i32_0 = arith.constant 0 : i32
    return %1, %c0_i32 : i32, i32
  }
  func.func @transform_2(%arg0: i32, %arg1: i32) -> (i32, i32, i32) {
    %c0_i32 = arith.constant 0 : i32
    %c0_i32_0 = arith.constant 0 : i32
    %c0_i32_1 = arith.constant 0 : i32
    return %arg0, %c0_i32, %c0_i32_0 : i32, i32, i32
  }
}

</mosaic_0001>

<bundles_post_ra>
// kernel: bce_loss.1
= control target key start
LH: loop header
LB: loop body
LE: loop exit
PB: predicated region body
PF: predicated region fallthrough
CT: control target
= control target key end

     0   :  { %s498_s9 = smov 0   ;;  %s500_s10 = smov 0   ;;  %s580_s0 = inlined_call_operand.vmem [shape: f32[16,512], index: 0, kind: input, shape index: {}]   ;;  %s581_s1 = inlined_call_operand.vmem [shape: f32[16,512], index: 1, kind: input, shape index: {}]   ;;  %s582_s2 = inlined_call_operand.vmem [shape: f32[2,8,128], index: 2, kind: output, shape index: {}]  }
   0x1   :  { %s502_s11 = smov 0  }
   0x2 LB: > { %s24_s12 = sadd.s32 1, %s477_s10  ;;  %p407_p0 = scmp.ge.s32.totalorder %s481_s11, 1  ;;  %s481_s11 = sphi %s502_s11, %s12_s11   ;;  %s477_s10 = sphi %s500_s10, %s590_s10   ;;  %s473_s9 = sphi %s498_s9, %s589_s9  }
   0x3   : > { %p26_p1 = scmp.ge.s32.totalorder %s24_s12, 2  ;;  %p142_p2 = scmp.lt.s32.totalorder %s481_s11, 3 }
   0x5   : > { %s592_s12 = smov (%p26_p1, %s24_s12), 0  ;;  %p143_p3 = pnand %p407_p0, %p142_p2 }
   0x6   : > { %p171_p4 = scmp.lt.s32.totalorder (!%p143_p3), %s473_s9, 1 }
   0x7   : > { %146 = sbr.rel (%p143_p3) target bundleno = 274 (0x112), region = 28 }
   0xc   : > { %s594_s9 = smov (!%p171_p4, %s473_s9), 1 }
   0xd   : > { %s415_s13 = sshll.u32 %s594_s9, 5  ;;  %s412_s20 = sshll.u32 %s594_s9, 3 }
   0xe   : > { %s175_s16 = scalar_lea.vmem %s580_s0, %s415_s13  ;;  %s182_s19 = scalar_lea.vmem %s581_s1, %s415_s13 }
   0xf   : > { %v524_v0 = vld [vmem:[%s175_s16] sm:$0xff]  ;;  %v526_v1 = vld [vmem:[%s175_s16 + $0x8] sm:$0xff]  ;;  %v528_v2 = vld [vmem:[%s175_s16 + $0x10] sm:$0xff]  ;;  %s187_s23 = scalar_lea.vmem %s582_s2, %s412_s20 }
  0x10   : > { %v530_v3 = vld [vmem:[%s175_s16 + $0x18] sm:$0xff]  ;;  %v212_v4 = vand.u32 2147483647, %v524_v0  ;;  %v213_v5 = vand.u32 2147483647, %v526_v1  ;;  %v204_v29 = vsub.f32 0.0, %v524_v0 }
  0x11   : > { %v214_v6 = vand.u32 2147483647, %v528_v2  ;;  %v215_v7 = vand.u32 2147483647, %v530_v3  ;;  %v205_v32 = vsub.f32 0.0, %v526_v1  ;;  %v206_v35 = vsub.f32 0.0, %v528_v2 }
  0x12   : > { %v216_v8 = vsub.f32 0.0, %v212_v4  ;;  %v217_v9 = vsub.f32 0.0, %v213_v5  ;;  %v207_v37 = vsub.f32 0.0, %v530_v3  ;;  %v208_v41 = vmax.f32 %v204_v29, 0.0  ;;  %v200_v51 = vld [vmem:[%s182_s19] sm:$0xff]  ;;  %v201_v55 = vld [vmem:[%s182_s19 + $0x8] sm:$0xff] }
  0x13   : > { %v218_v10 = vsub.f32 0.0, %v214_v6  ;;  %v219_v11 = vsub.f32 0.0, %v215_v7  ;;  %v209_v46 = vmax.f32 %v205_v32, 0.0  ;;  %v210_v52 = vmax.f32 %v206_v35, 0.0  ;;  %v202_v60 = vld [vmem:[%s182_s19 + $0x10] sm:$0xff]  ;;  %v203_v4 = vld [vmem:[%s182_s19 + $0x18] sm:$0xff] }
  0x14   : > { %v220_v12 = vmul.f32 1.442695, %v216_v8  ;;  %v222_v13 = vmul.f32 1.442695, %v217_v9  ;;  %v211_v61 = vmax.f32 %v207_v37, 0.0  ;;  %v280_v8 = vsub.f32 1.0, %v200_v51 }
  0x15   : > { %v224_v14 = vmul.f32 1.442695, %v218_v10  ;;  %v226_v15 = vmul.f32 1.442695, %v219_v11 }
  0x16   : > { %443 = vpow2.f32 %v220_v12  ;;  %v281_v12 = vsub.f32 1.0, %v201_v55 }
  0x17   : > { %445 = vpow2.f32 %v222_v13 }
  0x18   : > { %447 = vpow2.f32 %v224_v14 }
  0x19   : > { %449 = vpow2.f32 %v226_v15 }
  0x23   : > { %v444_v16 = vpop.eup %443 }
  0x24   : > { %v446_v17 = vpop.eup %445  ;;  %v228_v18 = vadd.f32 1.0, %v444_v16  ;;  %v231_v24 = vmul.f32 -0.5, %v444_v16  ;;  %v234_v30 = vand.u32 2147483647, %v444_v16 }
  0x25   : > { %v448_v19 = vpop.eup %447  ;;  %v237_v20 = vadd.f32 1.0, %v446_v17  ;;  %v240_v25 = vmul.f32 -0.5, %v446_v17  ;;  %v243_v33 = vand.u32 2147483647, %v446_v17 }
  0x26   : > { %v450_v21 = vpop.eup %449  ;;  %451 = vlog2.f32 %v228_v18  ;;  %v246_v22 = vadd.f32 1.0, %v448_v19  ;;  %v249_v26 = vmul.f32 -0.5, %v448_v19  ;;  %v232_v27 = vadd.f32 1.0, %v231_v24 }
  0x27   : > { %453 = vlog2.f32 %v237_v20  ;;  %v255_v23 = vadd.f32 1.0, %v450_v21  ;;  %v258_v28 = vmul.f32 -0.5, %v450_v21  ;;  %v241_v31 = vadd.f32 1.0, %v240_v25 }
  0x28   : > { %455 = vlog2.f32 %v246_v22  ;;  %v250_v34 = vadd.f32 1.0, %v249_v26  ;;  %v252_v36 = vand.u32 2147483647, %v448_v19  ;;  %v233_v38 = vmul.f32 %v444_v16, %v232_v27 }
  0x29   : > { %457 = vlog2.f32 %v255_v23  ;;  %v259_v39 = vadd.f32 1.0, %v258_v28  ;;  %vm545_vm0 = vcmp.lt.f32.partialorder %v234_v30, 0.0004427343  ;;  %v242_v43 = vmul.f32 %v446_v17, %v241_v31 }
  0x2a   : > { %v261_v44 = vand.u32 2147483647, %v450_v21  ;;  %vm549_vm1 = vcmp.lt.f32.partialorder %v243_v33, 0.0004427343  ;;  %v251_v49 = vmul.f32 %v448_v19, %v250_v34  ;;  %vm553_vm2 = vcmp.lt.f32.partialorder %v252_v36, 0.0004427343 }
  0x2b   : > { %v260_v58 = vmul.f32 %v450_v21, %v259_v39  ;;  %v282_v16 = vsub.f32 1.0, %v202_v60  ;;  %v283_v20 = vsub.f32 1.0, %v203_v4 }
  0x2c   : > { %vm262_vm3 = vcmp.lt.f32.partialorder %v261_v44, 0.0004427343 }
  0x33   : > { %v452_v40 = vpop.eup %451 }
  0x34   : > { %v454_v45 = vpop.eup %453  ;;  %v230_v47 = vmul.f32 0.6931472, %v452_v40 }
  0x35   : > { %v456_v50 = vpop.eup %455  ;;  %v239_v53 = vmul.f32 0.6931472, %v454_v45 }
  0x36   : > { %v236_v56 = vsel %vm545_vm0, %v233_v38, %v230_v47  ;;  %v248_v57 = vmul.f32 0.6931472, %v456_v50  ;;  %v458_v59 = vpop.eup %457 }
  0x37   : > { %v245_v62 = vsel %vm549_vm1, %v242_v43, %v239_v53  ;;  %v264_v63 = vadd.f32 %v236_v56, %v208_v41  ;;  %v257_v6 = vmul.f32 0.6931472, %v458_v59 }
  0x38   : > { %v254_v5 = vsel %vm553_vm2, %v251_v49, %v248_v57  ;;  %v265_v7 = vadd.f32 %v245_v62, %v209_v46 }
  0x39   : > { %v266_v9 = vadd.f32 %v254_v5, %v210_v52  ;;  %v268_v10 = vadd.f32 %v264_v63, %v524_v0  ;;  %v272_v11 = vmin.f32 %v264_v63, 100.0  ;;  %v263_v13 = vsel %vm262_vm3, %v260_v58, %v257_v6 }
  0x3a   : > { %v269_v14 = vadd.f32 %v265_v7, %v526_v1  ;;  %v273_v15 = vmin.f32 %v265_v7, 100.0  ;;  %v267_v17 = vadd.f32 %v263_v13, %v211_v61 }
  0x3b   : > { %v270_v18 = vadd.f32 %v266_v9, %v528_v2  ;;  %v274_v19 = vmin.f32 %v266_v9, 100.0  ;;  %v276_v21 = vmul.f32 %v272_v11, %v200_v51  ;;  %v284_v23 = vmin.f32 %v268_v10, 100.0 }
  0x3c   : > { %v277_v22 = vmul.f32 %v273_v15, %v201_v55  ;;  %v285_v24 = vmin.f32 %v269_v14, 100.0  ;;  %v271_v25 = vadd.f32 %v267_v17, %v530_v3  ;;  %v275_v26 = vmin.f32 %v267_v17, 100.0 }
  0x3d   : > { %v278_v0 = vmul.f32 %v274_v19, %v202_v60  ;;  %v286_v27 = vmin.f32 %v270_v18, 100.0  ;;  %v288_v28 = vmul.f32 %v284_v23, %v280_v8 }
  0x3e   : > { %v289_v29 = vmul.f32 %v285_v24, %v281_v12  ;;  %v279_v30 = vmul.f32 %v275_v26, %v203_v4  ;;  %v287_v1 = vmin.f32 %v271_v25, 100.0 }
  0x3f   : > { %v290_v31 = vmul.f32 %v286_v27, %v282_v16  ;;  %v292_v32 = vadd.f32 %v288_v28, %v276_v21 }
  0x40   : > { %v293_v33 = vadd.f32 %v289_v29, %v277_v22  ;;  %v291_v2 = vmul.f32 %v287_v1, %v283_v20 }
  0x41   : > { %v294_v34 = vadd.f32 %v290_v31, %v278_v0 }
  0x42   : > { %v315_v35 = vadd.f32 %v293_v33, %v292_v32  ;;  %v295_v36 = vadd.f32 %v291_v2, %v279_v30 }
  0x44   : > { %v316_v37 = vadd.f32 %v315_v35, %v294_v34 }
  0x46   : > { %v317_v38 = vadd.f32 %v316_v37, %v295_v36 }
  0x48   : > { %318 = vadd.xlane.f32.xlu0 %v317_v38 }
  0xd1   : > { %v319_v39 = vpop.xlane.xlu0 %318 }
  0xd2   : > { %v320_v3 = vrot.slane %v319_v39, 4 }
  0xd4   : > { %v321_v40 = vadd.f32 %v320_v3, %v319_v39 }
  0xd6   : > { %v322_v41 = vrot.slane %v321_v40, 2 }
  0xd8   : > { %v323_v42 = vadd.f32 %v322_v41, %v321_v40 }
  0xda   : > { %v324_v43 = vrot.slane %v323_v42, 1 }
  0xdc   : > { %v325_v44 = vadd.f32 %v324_v43, %v323_v42 }
  0xde   : > { %417 = vpush %v325_v44 }
 0x10f   : > { %s418_s24 = spop %417 }
 0x110   : > { %v327_v45 = vstv %s418_s24 }
 0x111   : > { %329 = vst [vmem:[%s187_s23] sm:$0xff] %v327_v45 }
 0x112 PF: > { %s12_s11 = sadd.s32 1, %s481_s11   ;;  %s589_s9 = smov %s477_s10 }
 0x113   : > { %p9_p5 = scmp.ge.s32.totalorder %s12_s11, 4   ;;  %s590_s10 = smov %s592_s12 }
 0x115   :  { %11 = sbr.rel (!%p9_p5) target bundleno = 2 (0x2), region = 69 }

</bundles_post_ra>
